<compile_context>
chip_gen: v6e
topology: v6e:2x2x1
jax: 0.10.0
libtpu: 0.0.40
codegen_flags: <defaults>
</compile_context>

<pallas_src>
import functools

import jax
import jax.numpy as jnp
from jax.experimental import pallas as pl
from jax.experimental.pallas import tpu as pltpu


def _framewise_kernel(x_ref, o_ref, *, pad_type):
    # Main path. x_ref: (tm, HW) row tile; o_ref: (tm, HW) one time-frame slot.
    # Full-block, lane-dense stores only.
    if pad_type == "repeat":
        o_ref[...] = x_ref[...]
    else:  # "zero": frame 0 is the image, later frames are zeros
        t = pl.program_id(1)

        @pl.when(t == 0)
        def _():
            o_ref[...] = x_ref[...]

        @pl.when(t != 0)
        def _():
            o_ref[...] = jnp.zeros_like(o_ref)


def _rowtile_kernel(x_ref, o_ref, *, ntimes, hw, pad_type):
    # Fallback path for lane-unaligned H*W.
    # x_ref: (tm, HW); o_ref: (tm, ntimes*HW), per-frame static slice stores.
    x = x_ref[...]
    zeros = None
    for t in range(ntimes):  # static unroll
        if pad_type == "repeat" or t == 0:
            o_ref[:, t * hw:(t + 1) * hw] = x
        else:
            if zeros is None:
                zeros = jnp.zeros_like(x)
            o_ref[:, t * hw:(t + 1) * hw] = zeros


def pad_im2video(x, *, ntimes, pad_type, time_dim=2, tm=None):
    """PadIm2Video forward. x: [B,C,H,W] or [B,C,T,H,W]. Returns [B,C,ntimes,H,W]."""
    assert ntimes > 0
    assert pad_type in ("zero", "repeat")
    assert time_dim == 2, "kernel implements the module default time_dim=2"

    if x.ndim == 4:
        B, C, H, W = x.shape
    elif x.ndim == 5:
        B, C, T_in, H, W = x.shape
        if T_in != 1:
            return x  # already a video: module returns it unchanged
    else:
        raise ValueError(f"Dimension incorrect {x.shape}")

    if ntimes == 1:
        # Nothing to pad; just the unsqueeze (pure metadata).
        return x.reshape(B, C, 1, H, W)

    M = B * C
    HW = H * W
    itemsize = jnp.dtype(x.dtype).itemsize
    x2 = x.reshape(M, HW)  # contiguous reshape, no data movement

    aligned = (HW % 128 == 0)

    # --- Per-generation VMEM budgeting (v7x has only 64 MiB physical). ---
    try:
        phys_vmem = pltpu.get_tpu_info().vmem_capacity_bytes
    except Exception:  # pragma: no cover - defensive fallback
        phys_vmem = 64 * 1024 * 1024  # conservative (v7x-sized) assumption
    vmem_limit = min(int(phys_vmem * 0.75), 96 * 1024 * 1024)
    budget = int(vmem_limit * 0.6)  # headroom for compiler-internal scratch

    if aligned:
        # grid-over-t: double-buffered input tile + double-buffered 1-frame out tile
        per_row_bytes = 4 * HW * itemsize
    else:
        # wide-output tile: double-buffered input + double-buffered ntimes-wide out
        per_row_bytes = 2 * (1 + ntimes) * HW * itemsize

    # Packed-sublane multiple: f32 -> 8, bf16 -> 16, int8/fp8 -> 32.
    sub = max(8, 32 // itemsize)

    if tm is None:
        tm = budget // max(per_row_bytes, 1)
        tm = max(sub, (tm // sub) * sub)
        tm = min(tm, 1024)  # diminishing returns past ~512-1024 rows
    if tm >= M:
        # Keep >= 2 row steps when possible so megacore can shard rows (v7x).
        half = (((M + 1) // 2 + sub - 1) // sub) * sub
        tm = half if half < M else M

    rsteps = (M + tm - 1) // tm  # ragged last tile handled by Pallas (no jnp.pad)

    cost = pl.CostEstimate(
        flops=0,
        transcendentals=0,
        bytes_accessed=itemsize * M * HW * (1 + ntimes),
    )

    if aligned:
        out = pl.pallas_call(
            functools.partial(_framewise_kernel, pad_type=pad_type),
            out_shape=jax.ShapeDtypeStruct((M, ntimes * HW), x.dtype),
            grid_spec=pltpu.PrefetchScalarGridSpec(
                num_scalar_prefetch=0,
                grid=(rsteps, ntimes),  # t innermost -> input tile stays resident
                in_specs=[pl.BlockSpec((tm, HW), lambda i, t: (i, 0))],
                out_specs=pl.BlockSpec((tm, HW), lambda i, t: (i, t)),
            ),
            compiler_params=pltpu.CompilerParams(
                dimension_semantics=(
                    "parallel",
                    "arbitrary" if rsteps > 1 else "parallel",
                ),
                vmem_limit_bytes=vmem_limit,
            ),
            cost_estimate=cost,
        )(x2)
    else:
        out = pl.pallas_call(
            functools.partial(
                _rowtile_kernel, ntimes=ntimes, hw=HW, pad_type=pad_type
            ),
            out_shape=jax.ShapeDtypeStruct((M, ntimes * HW), x.dtype),
            grid_spec=pltpu.PrefetchScalarGridSpec(
                num_scalar_prefetch=0,
                grid=(rsteps,),
                in_specs=[pl.BlockSpec((tm, HW), lambda i: (i, 0))],
                out_specs=pl.BlockSpec((tm, ntimes * HW), lambda i: (i, 0)),
            ),
            compiler_params=pltpu.CompilerParams(
                dimension_semantics=("parallel",),
                vmem_limit_bytes=vmem_limit,
            ),
            cost_estimate=cost,
        )(x2)

    # (M, ntimes*HW) row-major is bit-identical to (B, C, ntimes, H, W): free.
    return out.reshape(B, C, ntimes, H, W)


def _reference(x, *, ntimes, pad_type, time_dim=2):
    # Pure-JAX reference of the PyTorch forward.
    if x.ndim == 4:
        x = jnp.expand_dims(x, time_dim)
    elif x.ndim != 5:
        raise ValueError(f"Dimension incorrect {x.shape}")
    if x.shape[time_dim] == 1:
        if pad_type == "repeat":
            reps = [1] * x.ndim
            reps[time_dim] = ntimes
            x = jnp.tile(x, reps)
        elif pad_type == "zero":
            pads = [(0, 0)] * x.ndim
            pads[time_dim] = (0, ntimes - x.shape[time_dim])
            x = jnp.pad(x, pads)
    return x


if __name__ == "__main__":
    key = jax.random.PRNGKey(0)

    B, C, H, W = 2, 4, 16, 16
    ntimes = 2  # ImageBind uses PadIm2Video(pad_type="repeat", ntimes=2)

    x = jax.random.normal(key, (B, C, H, W), dtype=jnp.float32)

    out_rep = jax.block_until_ready(
        pad_im2video(x, ntimes=ntimes, pad_type="repeat"))
    out_zero = jax.block_until_ready(
        pad_im2video(x, ntimes=ntimes, pad_type="zero"))

    ref_rep = _reference(x, ntimes=ntimes, pad_type="repeat")
    ref_zero = _reference(x, ntimes=ntimes, pad_type="zero")

    assert out_rep.shape == (B, C, ntimes, H, W)
    assert out_zero.shape == (B, C, ntimes, H, W)
    assert jnp.array_equal(out_rep, ref_rep)
    assert jnp.array_equal(out_zero, ref_zero)

    # bf16 activations (packed-sublane multiple = 16).
    xb = x.astype(jnp.bfloat16)
    assert jnp.array_equal(
        pad_im2video(xb, ntimes=ntimes, pad_type="repeat"),
        _reference(xb, ntimes=ntimes, pad_type="repeat"))

    # Lane-unaligned H*W exercises the wide-tile fallback path.
    xu = jax.random.normal(key, (B, C, 10, 10), dtype=jnp.float32)
    assert jnp.array_equal(
        pad_im2video(xu, ntimes=3, pad_type="repeat"),
        _reference(xu, ntimes=3, pad_type="repeat"))
    assert jnp.array_equal(
        pad_im2video(xu, ntimes=3, pad_type="zero"),
        _reference(xu, ntimes=3, pad_type="zero"))

    # 5-D inputs: T == 1 gets padded, T != 1 passes through unchanged.
    x5 = x.reshape(B, C, 1, H, W)
    assert jnp.array_equal(
        pad_im2video(x5, ntimes=ntimes, pad_type="repeat"), ref_rep)
    xv = jax.random.normal(key, (B, C, 3, H, W), dtype=jnp.float32)
    assert jnp.array_equal(
        pad_im2video(xv, ntimes=ntimes, pad_type="repeat"), xv)

    print("KERNEL_OK")
</pallas_src>

<mosaic_0001>
module attributes {stable_mosaic.version = 11 : i64} {
  func.func @_framewise_kernel(%arg0: i32, %arg1: i32, %arg2: memref<8x256xf32, #tpu.memory_space<vmem>>, %arg3: memref<8x256xf32, #tpu.memory_space<vmem>>) attributes {dimension_semantics = [#tpu.dimension_semantics<parallel>, #tpu.dimension_semantics<parallel>], iteration_bounds = array<i64: 1, 2>, scalar_prefetch = 0 : i64, scratch_operands = 0 : i64, tpu.core_type = #tpu.core_type<tc>, window_params = [{transform_indices = @transform_0, window_bounds = array<i64: 8, 256>}, {transform_indices = @transform_1, window_bounds = array<i64: 8, 256>}]} {
    %c0 = arith.constant 0 : index
    %c0_0 = arith.constant 0 : index
    %0 = vector.load %arg2[%c0, %c0_0] : memref<8x256xf32, #tpu.memory_space<vmem>>, vector<8x256xf32>
    %c0_1 = arith.constant 0 : index
    %c0_2 = arith.constant 0 : index
    %1 = vector.load %arg3[%c0_1, %c0_2] : memref<8x256xf32, #tpu.memory_space<vmem>>, vector<8x256xf32>
    tpu.vector_store %arg3[%c0_1, %c0_2], %0 {strides = array<i32>} : memref<8x256xf32, #tpu.memory_space<vmem>>, vector<8x256xf32>,
    return
  }
  func.func @transform_0(%arg0: i32, %arg1: i32) -> (i32, i32) {
    %c0_i32 = arith.constant 0 : i32
    %c0_i32_0 = arith.constant 0 : i32
    return %arg0, %c0_i32 : i32, i32
  }
  func.func @transform_1(%arg0: i32, %arg1: i32) -> (i32, i32) {
    %c0_i32 = arith.constant 0 : i32
    return %arg0, %arg1 : i32, i32
  }
}

</mosaic_0001>

<bundles_post_ra>
// kernel: tpu_custom_call.1
= control target key start
LH: loop header
LB: loop body
LE: loop exit
PB: predicated region body
PF: predicated region fallthrough
CT: control target
= control target key end

     0   :  { %6 = vsyncpa [#allocation3], 0  ;;  %s550_s0 = inlined_call_operand.hbm [shape: f32[8,256], index: 0, kind: input, shape index: {}]   ;;  %s551_s1 = inlined_call_operand.hbm [shape: f32[8,512], index: 1, kind: output, shape index: {}]  }
   0x1   :  { %7 = vsyncpa [#allocation4], 0 }
   0x2   :  { %9 = vsyncpa [#allocation4 + $0x1], 0  ;;  %s423_s6 = smov 0   ;;  %s425_s7 = smov 0  }
   0x3   :  { %s427_s8 = smov 0   ;;  %s429_s9 = smov 0  }
   0x4   :  { %s431_s10 = smov 0   ;;  %s433_s11 = smov 0  }
   0x5 LB: > { %s224_s12 = sadd.s32 4294967295, %s409_s11   ;;  %s225_s13 = sadd.s32 4294967294, %s409_s11   ;;  %s409_s11 = sphi %s433_s11, %s15_s11   ;;  %s405_s10 = sphi %s431_s10, %s560_s10   ;;  %s401_s9 = sphi %s429_s9, %s559_s9   ;;  %s397_s8 = sphi %s427_s8, %s558_s8   ;;  %s393_s7 = sphi %s425_s7, %s557_s7   ;;  %s389_s6 = sphi %s423_s6, %s556_s6  }
   0x6   : > { %s24_s14 = sadd.s32 1, %s405_s10  ;;  %s62_s15 = sadd.s32 1, %s397_s8 }
   0x7   : > { %p25_p0 = scmp.ge.s32.totalorder %s24_s14, 2  ;;  %p72_p1 = scmp.ne.s32.totalorder %s397_s8, %s393_s7 }
   0x8   : > { %p73_p2 = scmp.eq.s32.totalorder %s224_s12, 1  ;;  %p78_p3 = scmp.ne.s32.totalorder %s393_s7, %s389_s6 }
   0x9   : > { %s562_s14 = smov (%p25_p0, %s24_s14), 0  ;;  %p79_p5 = scmp.eq.s32.totalorder %s225_s13, 1 }
   0xa   : > { %p463_p4 = por %p73_p2, %p72_p1  ;;  %s58_s17 = ssub.s32 %s405_s10, %s562_s14 }
   0xb   : > { %p226_p6 = scmp.ge.s32.totalorder %s409_s11, 1  ;;  %p60_p7 = scmp.eq.s32.totalorder %s58_s17, 0 }
   0xc   : > { %p470_p8 = por %p79_p5, %p78_p3  ;;  %p86_p9 = scmp.lt.s32.totalorder %s409_s11, 3 }
   0xd   : > { %s476_s19 = scalar_select %p60_p7, %s397_s8, %s62_s15  }
   0xe   : > { %p478_p10 = pnand %p226_p6, %p86_p9  ;;  %p482_p11 = scmp.eq.s32.totalorder %s224_s12, 0 }
   0xf   : > { %s411_s22 = smov [#allocation2]  }
  0x10   : > { %p243_p12 = pneg %p478_p10  ;;  %s102_s23 = sshll.u32 %s411_s22, 4  ;;  %s103_s23 = int_to_ptr.vmem [resolvable:$true] %s102_s23 }
  0x11   : > { %s314_s24 = scalar_lea.vmem %s103_s23, 256  ;;  %p322_p5 = scmp.lt.s32.totalorder %s103_s23, %s103_s23 }
  0x12   : > { %p244_p13 = pnand %p482_p11, %p243_p12  ;;  %p315_p1 = scmp.ne.s32.totalorder %s103_s23, %s314_s24 }
  0x13   : > { %p323_p6 = scmp.lt.s32.totalorder %s314_s24, %s314_s24 }
  0x14   : > { %p305_p0 = pneg %p244_p13 }
  0x15   : > { %p324_p7 = por %p323_p6, %p322_p5 }
  0x16   : > { %p317_p2 = pnand %p315_p1, %p305_p0 }
  0x18   : > { %p318_p3 = pneg %p317_p2 }
  0x1a   : > { %p325_p9 = pnand %p324_p7, %p318_p3 }
  0x1c   : > { %328 = shalt.err (!%p325_p9)
}
  0x1d   : > { %246 = dma.hbm_to_vmem [thread:$0]  (!%p244_p13), %s550_s0, 256, %s103_s23, [#allocation3]  }
  0x1e   : > { %115 = sbr.rel (%p478_p10) target bundleno = 61 (0x3d), region = 24 }
  0x23   : > { %380 = dma.done.wait (%p482_p11), [#allocation3], 256  }
  0x24   : > { %382 = vsyncadd (%p482_p11), [#allocation3], 4294967040  ;;  %s127_s27 = sand.u32 1, %s393_s7   ;;  %s236_s2 = sshll.u32 %s401_s9, 8  ;;  %v131_v0 = vld [vmem:[#allocation2] sm:$0xff]  ;;  %v132_v1 = vld [vmem:[#allocation2 + $0x8] sm:$0xff] }
  0x25   : > { %s230_s28 = sshll.u32 %s127_s27, 4  ;;  %s506_s5 = scalar_lea.hbm %s551_s1, %s236_s2 }
  0x26   : > { %s129_s29 = scalar_lea.vmem [#allocation5], %s230_s28  ;;  %s136_s12 = scalar_lea.sflag [#allocation4], %s127_s27 }
  0x27   : > { %s152_s30 = sshll.u32 %s129_s29, 4  ;;  %133 = vst [vmem:[%s129_s29] sm:$0xff] %v131_v0  ;;  %134 = vst [vmem:[%s129_s29 + $0x8] sm:$0xff] %v132_v1  ;;  %s412_s9 = smov [#allocation5]   ;;  %s501_s30 = int_to_ptr.vmem [resolvable:$true] %s152_s30 }
  0x28   : > { %s329_s13 = scalar_lea.vmem %s501_s30, 256  ;;  %s333_s15 = sshll.u32 %s412_s9, 4  ;;  %s334_s15 = int_to_ptr.vmem [resolvable:$false] %s333_s15 }
  0x29   : > { %p330_p10 = scmp.ne.s32.totalorder %s501_s30, %s329_s13  ;;  %s335_s17 = scalar_lea.vmem %s334_s15, 512 }
  0x2a   : > { %p336_p13 = scmp.lt.s32.totalorder %s501_s30, %s334_s15  ;;  %p337_p0 = scmp.lt.s32.totalorder %s335_s17, %s329_s13 }
  0x2b   : > { %p331_p11 = pnand %p330_p10, %p463_p4 }
  0x2c   : > { %p338_p1 = por %p337_p0, %p336_p13 }
  0x2d   : > { %p332_p12 = pneg %p331_p11 }
  0x2f   : > { %p339_p2 = pnand %p338_p1, %p332_p12 }
  0x31   : > { %342 = shalt.err (!%p339_p2)
}
  0x32   : > { %s343_s20 = scalar_lea.hbm %s506_s5, 256  ;;  %s347_s23 = scalar_lea.hbm %s551_s1, 512 }
  0x33   : > { %p344_p3 = scmp.ne.s32.totalorder %s506_s5, %s343_s20  ;;  %p348_p7 = scmp.lt.s32.totalorder %s506_s5, %s551_s1 }
  0x34   : > { %p349_p9 = scmp.lt.s32.totalorder %s347_s23, %s343_s20 }
  0x35   : > { %p345_p5 = pnand %p344_p3, %p463_p4 }
  0x36   : > { %p350_p10 = por %p349_p9, %p348_p7 }
  0x37   : > { %p346_p6 = pneg %p345_p5 }
  0x39   : > { %p351_p11 = pnand %p350_p10, %p346_p6 }
  0x3b   : > { %354 = shalt.err (!%p351_p11)
}
  0x3c   : > { %241 = dma.vmem_to_hbm [thread:$0]  (%p463_p4), %s501_s30, 256, %s506_s5, %s136_s12  }
  0x3d PF: > { %p253_p12 = scmp.ge.s32.totalorder %s409_s11, 2  ;;  %s164_s26 = sand.u32 1, %s389_s6  }
  0x3e   : > { %s165_s27 = scalar_lea.sflag [#allocation4], %s164_s26 }
  0x3f   : > { %p248_p13 = pnand %p253_p12, %p470_p8 }
  0x41   : > { %p249_p0 = pneg %p248_p13 }
  0x43   : > { %384 = dma.done.wait (%p249_p0), %s165_s27, 256  }
  0x44   : > { %386 = vsyncadd (%p249_p0), %s165_s27, 4294967040  ;;  %s15_s11 = sadd.s32 1, %s409_s11   ;;  %s556_s6 = smov %s393_s7 }
  0x45   : > { %p12_p1 = scmp.ge.s32.totalorder %s15_s11, 4   ;;  %s557_s7 = smov %s397_s8 }
  0x46   : > { %s558_s8 = smov %s476_s19  ;;  %s559_s9 = smov %s405_s10 }
  0x47   : > { %s560_s10 = smov %s562_s14  ;;  %14 = sbr.rel (!%p12_p1) target bundleno = 5 (0x5), region = 62 }
  0x4c   :  { %170 = vsyncpa [#allocation3], 1 }
  0x4d   :  { %172 = vsyncpa [#allocation3 + $0x1], 1 }
  0x4e   :  { %173 = vsyncpa [#allocation4], 1 }
  0x4f   :  { %175 = vsyncpa [#allocation4 + $0x1], 1 }

</bundles_post_ra>
